<compile_context>
chip_gen: v7x
topology: tpu7x:2x2x1
jax: 0.10.0
libtpu: 0.0.40
codegen_flags: <defaults>
</compile_context>

<pallas_src>
import functools
import math

import jax
import jax.numpy as jnp
from jax import lax
from jax.experimental import pallas as pl
from jax.experimental.pallas import tpu as pltpu


def _round_up(x, m):
    return ((x + m - 1) // m) * m


def cross_attn_kernel(q_ref, kv_ref, mask_ref,
                      wq_ref, bq_ref, wk_ref, bk_ref, wv_ref, bv_ref,
                      o_ref,
                      k_sc, v_sc,
                      *, scale):
    i = pl.program_id(1)  # query-tile index within the current batch element

    # K/V projections depend only on the batch element; compute them once per
    # batch (first query tile) and cache them in VMEM scratch as bf16 MXU food.
    @pl.when(i == 0)
    def _():
        kv_in = kv_ref[0]                                           # [Skv_p, Hp] bf16
        k = jnp.dot(kv_in, wk_ref[...],
                    preferred_element_type=jnp.float32) + bk_ref[...]
        v = jnp.dot(kv_in, wv_ref[...],
                    preferred_element_type=jnp.float32) + bv_ref[...]
        k_sc[...] = k.astype(k_sc.dtype)
        v_sc[...] = v.astype(v_sc.dtype)

    # Query projection: bf16 inputs, f32 accumulate, f32 bias add.
    q = jnp.dot(q_ref[0], wq_ref[...],
                preferred_element_type=jnp.float32) + bq_ref[...]   # [TQ, Hp] f32

    # scores = Q @ K^T / sqrt(H) + mask.  dot_general contracts over H directly
    # so no explicit (XLU) transpose of K is materialized.
    scores = lax.dot_general(
        q.astype(jnp.bfloat16), k_sc[...],
        dimension_numbers=(((1,), (1,)), ((), ())),
        preferred_element_type=jnp.float32)                         # [TQ, Skv_p]
    scores = scores * scale + mask_ref[0].astype(jnp.float32)

    # Numerically stable softmax in f32.
    m = jnp.max(scores, axis=-1, keepdims=True)
    e = jnp.exp(scores - m)
    denom = jnp.sum(e, axis=-1, keepdims=True)                      # [TQ, 1]

    # TODO(synk): nn.Dropout(0.1) is identity in eval mode; train-mode dropout
    # (pltpu.prng_random_bits masking of `e`) not implemented.

    # Unnormalized context, then fold 1/denom in as a cheap [TQ, Hp] scale
    # computed with the EUP approx reciprocal instead of a [TQ, Skv] divide.
    ctx = jnp.dot(e.astype(jnp.bfloat16), v_sc[...],
                  preferred_element_type=jnp.float32)               # [TQ, Hp] f32
    ctx = ctx * pl.reciprocal(denom, approx=True)
    o_ref[0] = ctx.astype(o_ref.dtype)


def cross_attention_pallas(q, kv, mask, wq, bq, wk, bk, wv, bv, *, tq_max=256):
    """q: [B,Sq,H], kv: [B,Skv,H], mask: [B,Sq,Skv] additive.
    Weights are [in, out] (pre-transposed from nn.Linear's [out, in]); biases [1, H]."""
    B, Sq, H = q.shape
    _, Skv, _ = kv.shape
    scale = 1.0 / math.sqrt(H)

    # TPU-friendly padded shapes: lane dims (H, and Skv as the score lane dim)
    # to multiples of 128; the query tile to a multiple of 8 sublanes.
    Hp = _round_up(H, 128)
    Skv_p = _round_up(Skv, 128)
    Sq_p = _round_up(Sq, 8)
    TQ = min(tq_max, Sq_p)
    Sq_p = _round_up(Sq_p, TQ)
    n_q_tiles = Sq_p // TQ

    bf16 = jnp.bfloat16
    q_p = jnp.zeros((B, Sq_p, Hp), bf16).at[:, :Sq, :H].set(q.astype(bf16))
    kv_p = jnp.zeros((B, Skv_p, Hp), bf16).at[:, :Skv, :H].set(kv.astype(bf16))
    # Padded KV columns get a large negative additive mask -> zero softmax weight.
    mask_p = jnp.full((B, Sq_p, Skv_p), -1e9, bf16)
    mask_p = mask_p.at[:, :Sq, :Skv].set(mask.astype(bf16))

    def pad_w(w):
        return jnp.zeros((Hp, Hp), bf16).at[:H, :H].set(w.astype(bf16))

    def pad_b(b):
        return jnp.zeros((1, Hp), jnp.float32).at[:, :H].set(b.astype(jnp.float32))

    wq_p, wk_p, wv_p = pad_w(wq), pad_w(wk), pad_w(wv)
    bq_p, bk_p, bv_p = pad_b(bq), pad_b(bk), pad_b(bv)

    # VMEM budget: double-buffered pipeline tiles + weights + K/V scratch +
    # f32 temporaries, clamped to [32 MiB, 64 MiB] so it is safe on v7x too.
    est = (2 * TQ * Hp * 2                       # q tiles
           + 2 * Skv_p * Hp * 2                  # kv block
           + 2 * TQ * Skv_p * 2                  # mask tiles
           + 2 * TQ * Hp * 4                     # out tiles
           + 2 * 3 * (Hp * Hp * 2 + Hp * 4)      # weights + biases
           + 2 * Skv_p * Hp * 2                  # K/V bf16 scratch
           + 4 * TQ * Skv_p * 4                  # scores / exp temporaries
           + 2 * TQ * Hp * 4 + 2 * Skv_p * Hp * 4)  # projection temporaries
    vmem_limit = int(min(max(2 * est, 32 << 20), 64 << 20))

    # TODO(synk): for very large Skv, add a KV grid axis with online-softmax
    # (flash-style m/l/acc scratch) to avoid the full [TQ, Skv] scores buffer.

    kernel = functools.partial(cross_attn_kernel, scale=scale)

    out_p = pl.pallas_call(
        kernel,
        out_shape=jax.ShapeDtypeStruct((B, Sq_p, Hp), jnp.float32),
        grid_spec=pltpu.PrefetchScalarGridSpec(
            num_scalar_prefetch=0,
            grid=(B, n_q_tiles),
            in_specs=[
                pl.BlockSpec((1, TQ, Hp), lambda b, i: (b, i, 0)),     # query tile
                pl.BlockSpec((1, Skv_p, Hp), lambda b, i: (b, 0, 0)),  # kv (resident per batch)
                pl.BlockSpec((1, TQ, Skv_p), lambda b, i: (b, i, 0)),  # additive mask tile
                pl.BlockSpec((Hp, Hp), lambda b, i: (0, 0)),           # Wq (in,out)
                pl.BlockSpec((1, Hp), lambda b, i: (0, 0)),            # bq
                pl.BlockSpec((Hp, Hp), lambda b, i: (0, 0)),           # Wk
                pl.BlockSpec((1, Hp), lambda b, i: (0, 0)),            # bk
                pl.BlockSpec((Hp, Hp), lambda b, i: (0, 0)),           # Wv
                pl.BlockSpec((1, Hp), lambda b, i: (0, 0)),            # bv
            ],
            out_specs=pl.BlockSpec((1, TQ, Hp), lambda b, i: (b, i, 0)),
            scratch_shapes=[
                pltpu.VMEM((Skv_p, Hp), jnp.bfloat16),   # projected K (cached per batch)
                pltpu.VMEM((Skv_p, Hp), jnp.bfloat16),   # projected V (cached per batch)
            ],
        ),
        compiler_params=pltpu.CompilerParams(
            # batch axis can be megacore-sharded; the query-tile axis must stay
            # in-order ("arbitrary") so the i==0 K/V-projection cache is valid.
            dimension_semantics=("parallel", "arbitrary"),
            vmem_limit_bytes=vmem_limit),
    )(q_p, kv_p, mask_p, wq_p, bq_p, wk_p, bk_p, wv_p, bv_p)

    return out_p[:, :Sq, :H]


def cross_attention_ref(q, kv, mask, wq, bq, wk, bk, wv, bv):
    """Pure-JAX f32 reference mirroring the PyTorch forward (eval mode)."""
    H = q.shape[-1]
    Q = q @ wq + bq
    K = kv @ wk + bk
    V = kv @ wv + bv
    scores = jnp.einsum("bqh,bkh->bqk", Q, K) / math.sqrt(H) + mask
    probs = jax.nn.softmax(scores, axis=-1)
    return jnp.einsum("bqk,bkh->bqh", probs, V)


if __name__ == "__main__":
    B, Sq, Skv, H = 2, 8, 8, 32
    key = jax.random.PRNGKey(0)
    k_q, k_kv, k_m, k_wq, k_bq, k_wk, k_bk, k_wv, k_bv = jax.random.split(key, 9)

    query_tensor = jax.random.normal(k_q, (B, Sq, H), dtype=jnp.float32)
    key_value_tensor = jax.random.normal(k_kv, (B, Skv, H), dtype=jnp.float32)
    # Additive attention mask (0 / -1e9 style); small random values here.
    attention_mask = 0.1 * jax.random.normal(k_m, (B, Sq, Skv), dtype=jnp.float32)

    # nn.Linear default init U(-1/sqrt(H), 1/sqrt(H)); weights already [in, out].
    bound = 1.0 / math.sqrt(H)
    wq = jax.random.uniform(k_wq, (H, H), jnp.float32, -bound, bound)
    bq = jax.random.uniform(k_bq, (1, H), jnp.float32, -bound, bound)
    wk = jax.random.uniform(k_wk, (H, H), jnp.float32, -bound, bound)
    bk = jax.random.uniform(k_bk, (1, H), jnp.float32, -bound, bound)
    wv = jax.random.uniform(k_wv, (H, H), jnp.float32, -bound, bound)
    bv = jax.random.uniform(k_bv, (1, H), jnp.float32, -bound, bound)

    out = cross_attention_pallas(query_tensor, key_value_tensor, attention_mask,
                                 wq, bq, wk, bk, wv, bv)
    out = jax.block_until_ready(out)

    ref = cross_attention_ref(query_tensor, key_value_tensor, attention_mask,
                              wq, bq, wk, bk, wv, bv)
    assert out.shape == (B, Sq, H)
    # bf16 MXU operands (f32 accumulate) -> loosened tolerance vs. pure-f32 ref.
    assert jnp.allclose(out, ref, atol=2e-2, rtol=2e-2), "mismatch vs reference"
    print("KERNEL_OK")
</pallas_src>

<mosaic_0001>
module attributes {stable_mosaic.version = 11 : i64} {
  func.func @cross_attn_kernel(%arg0: i32, %arg1: i32, %arg2: memref<1x8x128xbf16, #tpu.memory_space<vmem>>, %arg3: memref<1x128x128xbf16, #tpu.memory_space<vmem>>, %arg4: memref<1x8x128xbf16, #tpu.memory_space<vmem>>, %arg5: memref<128x128xbf16, #tpu.memory_space<vmem>>, %arg6: memref<1x128xf32, #tpu.memory_space<vmem>>, %arg7: memref<128x128xbf16, #tpu.memory_space<vmem>>, %arg8: memref<1x128xf32, #tpu.memory_space<vmem>>, %arg9: memref<128x128xbf16, #tpu.memory_space<vmem>>, %arg10: memref<1x128xf32, #tpu.memory_space<vmem>>, %arg11: memref<1x8x128xf32, #tpu.memory_space<vmem>>, %arg12: memref<128x128xbf16, #tpu.memory_space<vmem>>, %arg13: memref<128x128xbf16, #tpu.memory_space<vmem>>) attributes {dimension_semantics = [#tpu.dimension_semantics<parallel>, #tpu.dimension_semantics<arbitrary>], iteration_bounds = array<i64: 2, 1>, scalar_prefetch = 0 : i64, scratch_operands = 2 : i64, tpu.core_type = #tpu.core_type<tc>, window_params = [{transform_indices = @transform_0, window_bounds = array<i64: 1, 8, 128>}, {transform_indices = @transform_1, window_bounds = array<i64: 1, 128, 128>}, {transform_indices = @transform_2, window_bounds = array<i64: 1, 8, 128>}, {pipeline_mode = #tpu.pipeline_mode<synchronous>, transform_indices = @transform_3, window_bounds = array<i64: 128, 128>}, {pipeline_mode = #tpu.pipeline_mode<synchronous>, transform_indices = @transform_4, window_bounds = array<i64: 1, 128>}, {pipeline_mode = #tpu.pipeline_mode<synchronous>, transform_indices = @transform_5, window_bounds = array<i64: 128, 128>}, {pipeline_mode = #tpu.pipeline_mode<synchronous>, transform_indices = @transform_6, window_bounds = array<i64: 1, 128>}, {pipeline_mode = #tpu.pipeline_mode<synchronous>, transform_indices = @transform_7, window_bounds = array<i64: 128, 128>}, {pipeline_mode = #tpu.pipeline_mode<synchronous>, transform_indices = @transform_8, window_bounds = array<i64: 1, 128>}, {transform_indices = @transform_9, window_bounds = array<i64: 1, 8, 128>}]} {
    %c0_i32 = arith.constant 0 : i32
    %0 = arith.cmpi eq, %arg1, %c0_i32 : i32
    %1 = arith.extui %0 : i1 to i32
    %c0_i32_0 = arith.constant 0 : i32
    %2 = arith.cmpi ne, %1, %c0_i32_0 : i32
    scf.if %2 {
      %c0_22 = arith.constant 0 : index
      %c0_23 = arith.constant 0 : index
      %c0_24 = arith.constant 0 : index
      %35 = vector.load %arg3[%c0_22, %c0_23, %c0_24] : memref<1x128x128xbf16, #tpu.memory_space<vmem>>, vector<1x128x128xbf16>
      %36 = vector.shape_cast %35 : vector<1x128x128xbf16> to vector<128x128xbf16>
      %c0_25 = arith.constant 0 : index
      %c0_26 = arith.constant 0 : index
      %37 = vector.load %arg7[%c0_25, %c0_26] : memref<128x128xbf16, #tpu.memory_space<vmem>>, vector<128x128xbf16>
      %cst_27 = arith.constant dense<0.000000e+00> : vector<128x128xf32>
      %38 = tpu.matmul %36, %37, %cst_27 {dimension_numbers = #tpu.dot_dimension_numbers<[1], [0], [0], [1], [0, 0, 1, 1], [], []>} : vector<128x128xbf16>, vector<128x128xbf16>, vector<128x128xf32> -> vector<128x128xf32>
      %c0_28 = arith.constant 0 : index
      %c0_29 = arith.constant 0 : index
      %39 = vector.load %arg8[%c0_28, %c0_29] : memref<1x128xf32, #tpu.memory_space<vmem>>, vector<1x128xf32>
      %40 = vector.broadcast %39 : vector<1x128xf32> to vector<128x128xf32>
      %41 = arith.addf %38, %40 : vector<128x128xf32>
      %c0_30 = arith.constant 0 : index
      %c0_31 = arith.constant 0 : index
      %42 = vector.load %arg9[%c0_30, %c0_31] : memref<128x128xbf16, #tpu.memory_space<vmem>>, vector<128x128xbf16>
      %cst_32 = arith.constant dense<0.000000e+00> : vector<128x128xf32>
      %43 = tpu.matmul %36, %42, %cst_32 {dimension_numbers = #tpu.dot_dimension_numbers<[1], [0], [0], [1], [0, 0, 1, 1], [], []>} : vector<128x128xbf16>, vector<128x128xbf16>, vector<128x128xf32> -> vector<128x128xf32>
      %c0_33 = arith.constant 0 : index
      %c0_34 = arith.constant 0 : index
      %44 = vector.load %arg10[%c0_33, %c0_34] : memref<1x128xf32, #tpu.memory_space<vmem>>, vector<1x128xf32>
      %45 = vector.broadcast %44 : vector<1x128xf32> to vector<128x128xf32>
      %46 = arith.addf %43, %45 : vector<128x128xf32>
      %47 = arith.truncf %41 : vector<128x128xf32> to vector<128x128xbf16>
      %c0_35 = arith.constant 0 : index
      %c0_36 = arith.constant 0 : index
      %48 = vector.load %arg12[%c0_35, %c0_36] : memref<128x128xbf16, #tpu.memory_space<vmem>>, vector<128x128xbf16>
      tpu.vector_store %arg12[%c0_35, %c0_36], %47 {strides = array<i32>} : memref<128x128xbf16, #tpu.memory_space<vmem>>, vector<128x128xbf16>,
      %49 = arith.truncf %46 : vector<128x128xf32> to vector<128x128xbf16>
      %c0_37 = arith.constant 0 : index
      %c0_38 = arith.constant 0 : index
      %50 = vector.load %arg13[%c0_37, %c0_38] : memref<128x128xbf16, #tpu.memory_space<vmem>>, vector<128x128xbf16>
      tpu.vector_store %arg13[%c0_37, %c0_38], %49 {strides = array<i32>} : memref<128x128xbf16, #tpu.memory_space<vmem>>, vector<128x128xbf16>,
    } else {
    }
    %c0 = arith.constant 0 : index
    %c0_1 = arith.constant 0 : index
    %c0_2 = arith.constant 0 : index
    %3 = vector.load %arg2[%c0, %c0_1, %c0_2] : memref<1x8x128xbf16, #tpu.memory_space<vmem>>, vector<1x8x128xbf16>
    %4 = vector.shape_cast %3 : vector<1x8x128xbf16> to vector<8x128xbf16>
    %c0_3 = arith.constant 0 : index
    %c0_4 = arith.constant 0 : index
    %5 = vector.load %arg5[%c0_3, %c0_4] : memref<128x128xbf16, #tpu.memory_space<vmem>>, vector<128x128xbf16>
    %cst = arith.constant dense<0.000000e+00> : vector<8x128xf32>
    %6 = tpu.matmul %4, %5, %cst {dimension_numbers = #tpu.dot_dimension_numbers<[1], [0], [0], [1], [0, 0, 1, 1], [], []>} : vector<8x128xbf16>, vector<128x128xbf16>, vector<8x128xf32> -> vector<8x128xf32>
    %c0_5 = arith.constant 0 : index
    %c0_6 = arith.constant 0 : index
    %7 = vector.load %arg6[%c0_5, %c0_6] : memref<1x128xf32, #tpu.memory_space<vmem>>, vector<1x128xf32>
    %8 = vector.broadcast %7 : vector<1x128xf32> to vector<8x128xf32>
    %9 = arith.addf %6, %8 : vector<8x128xf32>
    %10 = arith.truncf %9 : vector<8x128xf32> to vector<8x128xbf16>
    %c0_7 = arith.constant 0 : index
    %c0_8 = arith.constant 0 : index
    %11 = vector.load %arg12[%c0_7, %c0_8] : memref<128x128xbf16, #tpu.memory_space<vmem>>, vector<128x128xbf16>
    %cst_9 = arith.constant dense<0.000000e+00> : vector<8x128xf32>
    %12 = tpu.matmul %10, %11, %cst_9 {dimension_numbers = #tpu.dot_dimension_numbers<[1], [1], [0], [0], [0, 0, 1, 0], [], []>} : vector<8x128xbf16>, vector<128x128xbf16>, vector<8x128xf32> -> vector<8x128xf32>
    %cst_10 = arith.constant 0.176776692 : f32
    %13 = vector.broadcast %cst_10 : f32 to vector<8x128xf32>
    %14 = arith.mulf %12, %13 : vector<8x128xf32>
    %c0_11 = arith.constant 0 : index
    %c0_12 = arith.constant 0 : index
    %c0_13 = arith.constant 0 : index
    %15 = vector.load %arg4[%c0_11, %c0_12, %c0_13] : memref<1x8x128xbf16, #tpu.memory_space<vmem>>, vector<1x8x128xbf16>
    %16 = vector.shape_cast %15 : vector<1x8x128xbf16> to vector<8x128xbf16>
    %17 = arith.extf %16 : vector<8x128xbf16> to vector<8x128xf32>
    %18 = arith.addf %14, %17 : vector<8x128xf32>
    %cst_14 = arith.constant dense<0xFF800000> : vector<8xf32>
    %19 = vector.multi_reduction <maximumf>, %18, %cst_14 [1] : vector<8x128xf32> to vector<8xf32>
    %20 = vector.shape_cast %19 : vector<8xf32> to vector<8x1xf32>
    %21 = vector.broadcast %20 : vector<8x1xf32> to vector<8x128xf32>
    %22 = arith.subf %18, %21 : vector<8x128xf32>
    %23 = math.exp %22 : vector<8x128xf32>
    %cst_15 = arith.constant dense<0.000000e+00> : vector<8xf32>
    %24 = vector.multi_reduction <add>, %23, %cst_15 [1] : vector<8x128xf32> to vector<8xf32>
    %25 = vector.shape_cast %24 : vector<8xf32> to vector<8x1xf32>
    %26 = arith.truncf %23 : vector<8x128xf32> to vector<8x128xbf16>
    %c0_16 = arith.constant 0 : index
    %c0_17 = arith.constant 0 : index
    %27 = vector.load %arg13[%c0_16, %c0_17] : memref<128x128xbf16, #tpu.memory_space<vmem>>, vector<128x128xbf16>
    %cst_18 = arith.constant dense<0.000000e+00> : vector<8x128xf32>
    %28 = tpu.matmul %26, %27, %cst_18 {dimension_numbers = #tpu.dot_dimension_numbers<[1], [0], [0], [1], [0, 0, 1, 1], [], []>} : vector<8x128xbf16>, vector<128x128xbf16>, vector<8x128xf32> -> vector<8x128xf32>
    %29 = tpu.reciprocal %25 {approx = true} : vector<8x1xf32> -> vector<8x1xf32>
    %30 = vector.broadcast %29 : vector<8x1xf32> to vector<8x128xf32>
    %31 = arith.mulf %28, %30 : vector<8x128xf32>
    %c0_19 = arith.constant 0 : index
    %c0_20 = arith.constant 0 : index
    %c0_21 = arith.constant 0 : index
    %32 = vector.load %arg11[%c0_19, %c0_20, %c0_21] : memref<1x8x128xf32, #tpu.memory_space<vmem>>, vector<1x8x128xf32>
    %33 = vector.shape_cast %32 : vector<1x8x128xf32> to vector<8x128xf32>
    %34 = vector.shape_cast %31 : vector<8x128xf32> to vector<1x8x128xf32>
    tpu.vector_store %arg11[%c0_19, %c0_20, %c0_21], %34 {strides = array<i32>} : memref<1x8x128xf32, #tpu.memory_space<vmem>>, vector<1x8x128xf32>,
    return
  }
  func.func @transform_0(%arg0: i32, %arg1: i32) -> (i32, i32, i32) {
    %c0_i32 = arith.constant 0 : i32
    %c0_i32_0 = arith.constant 0 : i32
    return %arg0, %arg1, %c0_i32 : i32, i32, i32
  }
  func.func @transform_1(%arg0: i32, %arg1: i32) -> (i32, i32, i32) {
    %c0_i32 = arith.constant 0 : i32
    %c0_i32_0 = arith.constant 0 : i32
    %c0_i32_1 = arith.constant 0 : i32
    return %arg0, %c0_i32, %c0_i32_0 : i32, i32, i32
  }
  func.func @transform_2(%arg0: i32, %arg1: i32) -> (i32, i32, i32) {
    %c0_i32 = arith.constant 0 : i32
    %c0_i32_0 = arith.constant 0 : i32
    return %arg0, %arg1, %c0_i32 : i32, i32, i32
  }
  func.func @transform_3(%arg0: i32, %arg1: i32) -> (i32, i32) {
    %c0_i32 = arith.constant 0 : i32
    %c0_i32_0 = arith.constant 0 : i32
    %c0_i32_1 = arith.constant 0 : i32
    return %c0_i32, %c0_i32_0 : i32, i32
  }
  func.func @transform_4(%arg0: i32, %arg1: i32) -> (i32, i32) {
    %c0_i32 = arith.constant 0 : i32
    %c0_i32_0 = arith.constant 0 : i32
    %c0_i32_1 = arith.constant 0 : i32
    return %c0_i32, %c0_i32_0 : i32, i32
  }
  func.func @transform_5(%arg0: i32, %arg1: i32) -> (i32, i32) {
    %c0_i32 = arith.constant 0 : i32
    %c0_i32_0 = arith.constant 0 : i32
    %c0_i32_1 = arith.constant 0 : i32
    return %c0_i32, %c0_i32_0 : i32, i32
  }
  func.func @transform_6(%arg0: i32, %arg1: i32) -> (i32, i32) {
    %c0_i32 = arith.constant 0 : i32
    %c0_i32_0 = arith.constant 0 : i32
    %c0_i32_1 = arith.constant 0 : i32
    return %c0_i32, %c0_i32_0 : i32, i32
  }
  func.func @transform_7(%arg0: i32, %arg1: i32) -> (i32, i32) {
    %c0_i32 = arith.constant 0 : i32
    %c0_i32_0 = arith.constant 0 : i32
    %c0_i32_1 = arith.constant 0 : i32
    return %c0_i32, %c0_i32_0 : i32, i32
  }
  func.func @transform_8(%arg0: i32, %arg1: i32) -> (i32, i32) {
    %c0_i32 = arith.constant 0 : i32
    %c0_i32_0 = arith.constant 0 : i32
    %c0_i32_1 = arith.constant 0 : i32
    return %c0_i32, %c0_i32_0 : i32, i32
  }
  func.func @transform_9(%arg0: i32, %arg1: i32) -> (i32, i32, i32) {
    %c0_i32 = arith.constant 0 : i32
    %c0_i32_0 = arith.constant 0 : i32
    return %arg0, %arg1, %c0_i32 : i32, i32, i32
  }
}

</mosaic_0001>

<bundles_post_ra>
// kernel: tpu_custom_call.1
= control target key start
LH: loop header
LB: loop body
LE: loop exit
PB: predicated region body
PF: predicated region fallthrough
CT: control target
= control target key end

     0   :  { %s2482_s0 = inlined_call_operand.hbm [shape: bf16[2,8,128], index: 0, kind: input, shape index: {}]   ;;  %s2483_s1 = inlined_call_operand.hbm [shape: bf16[2,128,128], index: 1, kind: input, shape index: {}]   ;;  %s2484_s2 = inlined_call_operand.hbm [shape: bf16[2,8,128], index: 2, kind: input, shape index: {}]   ;;  %s2485_s3 = inlined_call_operand.hbm [shape: bf16[128,128], index: 3, kind: input, shape index: {}]   ;;  %s2486_s4 = inlined_call_operand.vmem [shape: f32[1,128], index: 4, kind: input, shape index: {}]   ;;  %s2487_s5 = inlined_call_operand.hbm [shape: bf16[128,128], index: 5, kind: input, shape index: {}]   ;;  %s2488_s6 = inlined_call_operand.vmem [shape: f32[1,128], index: 6, kind: input, shape index: {}]   ;;  %s2489_s7 = inlined_call_operand.hbm [shape: bf16[128,128], index: 7, kind: input, shape index: {}]   ;;  %s2490_s8 = inlined_call_operand.vmem [shape: f32[1,128], index: 8, kind: input, shape index: {}]   ;;  %s2491_s9 = inlined_call_operand.hbm [shape: f32[2,8,128], index: 9, kind: output, shape index: {}]  }
   0x1   :  { %2514 = sst [smem:[#allocation27_spill]] %s2483_s1 }
   0x2   :  { %2515 = sst [smem:[#allocation28_spill]] %s2485_s3 }
   0x3   :  { %2516 = sst [smem:[#allocation29_spill]] %s2486_s4 }
   0x4   :  { %2517 = sst [smem:[#allocation30_spill]] %s2488_s6 }
   0x5   :  { %2518 = sst [smem:[#allocation31_spill]] %s2490_s8 }
   0x6   :  { %2519 = sst [smem:[#allocation32_spill]] %s2491_s9 }
   0x7   :  { %14 = vsyncpa [#allocation5], 0 }
   0x8   :  { %16 = vsyncpa [#allocation5 + $0x1], 0 }
   0x9   :  { %17 = vsyncpa [#allocation8], 0 }
   0xa   :  { %19 = vsyncpa [#allocation8 + $0x1], 0 }
   0xb   :  { %20 = vsyncpa [#allocation11], 0 }
   0xc   :  { %21 = vsyncpa [#allocation14], 0 }
   0xd   :  { %22 = vsyncpa [#allocation6], 0 }
   0xe   :  { %24 = vsyncpa [#allocation6 + $0x1], 0  ;;  %s2034_s30 = smov 0   ;;  %s2036_s10 = smov 0  }
   0xf   :  { %s2038_s11 = smov 0   ;;  %s2040_s12 = smov 0  }
  0x10   :  { %s2042_s13 = smov 0   ;;  %s2044_s14 = smov 0  }
  0x11 LB: > { %2520 = sst [smem:[#allocation21_spill]] %s1951_s30  ;;  %s2065_s15 = sadd.s32 4294967295, %s1971_s14   ;;  %s1971_s14 = sphi %s2044_s14, %s30_s14   ;;  %s1967_s13 = sphi %s2042_s13, %s2570_s13   ;;  %s1963_s12 = sphi %s2040_s12, %s2569_s12   ;;  %s1959_s11 = sphi %s2038_s11, %s2568_s11   ;;  %s1955_s10 = sphi %s2036_s10, %s2567_s10   ;;  %s1951_s30 = sphi %s2034_s30, %s2566_s30  }
  0x12   : > { %2521 = sst [smem:[#allocation22_spill]] %s1963_s12  ;;  %s1316_s16 = sadd.s32 4294967294, %s1971_s14  }
  0x13   : > { %p58_p0 = scmp.ne.s32.totalorder %s1959_s11, %s1955_s10  ;;  %p59_p1 = scmp.eq.s32.totalorder %s1971_s14, 0 }
  0x14   : > { %p64_p2 = scmp.ne.s32.totalorder %s1955_s10, %s1951_s30  ;;  %p2497_p3 = scmp.eq.s32.totalorder %s2065_s15, 0 }
  0x15   : > { %p270_p4 = scmp.eq.s32.totalorder %s2065_s15, 1  ;;  %p2076_p5 = por %p59_p1, %p58_p0 }
  0x16   : > { %p276_p6 = scmp.eq.s32.totalorder %s1316_s16, 1  ;;  %p2082_p7 = por %p2497_p3, %p64_p2 }
  0x17   : > { %p2086_p8 = por %p270_p4, %p58_p0  ;;  %p1317_p10 = scmp.ge.s32.totalorder %s1971_s14, 1 }
  0x18   : > { %s2523_s19 = scalar_select %p2082_p7, 1, 0 }
  0x19   : > { %s2524_s20 = scalar_select %p2086_p8, 1, 0 }
  0x1a   : > { %p2090_p9 = por %p276_p6, %p64_p2  ;;  %p283_p11 = scmp.lt.s32.totalorder %s1971_s14, 3 }
  0x1b   : > { %2525 = sst [smem:[#allocation23_spill]] %s2524_s20  ;;  %s1973_s23 = smov [#allocation10]  }
  0x1c   : > { %s2526_s21 = scalar_select %p2090_p9, 1, 0 }
  0x1d   : > { %p2096_p12 = pnand %p1317_p10, %p283_p11  ;;  %s295_s24 = sshll.u32 %s1973_s23, 4  ;;  %s2100_s24 = int_to_ptr.vmem [resolvable:$true] %s295_s24 }
  0x1e   : > { %2527 = sst [smem:[#allocation24_spill]] %s2526_s21  ;;  %s42_s26 = sadd.s32 1, %s1967_s13 }
  0x1f   : > { %s2528_s22 = scalar_select %p2096_p12, 1, 0 }
  0x20   : > { %p1580_p13 = pneg %p2096_p12  ;;  %s2114_s27 = sand.u32 1, %s1959_s11  }
  0x21   : > { %p2116_p4 = scmp.ge.s32.totalorder %s42_s26, 2  ;;  %s2531_s3 = sld [smem:[#allocation28_spill]] }
  0x22   : > { %p2108_p2 = pnand %p1580_p13, %p2497_p3 }
  0x24   : > { %s2529_s25 = scalar_select %p2108_p2, 1, 0 }
  0x25   : > { %p2128_p10 = pneg %p2108_p2 }
  0x27   : > { %s1703_s23 = scalar_lea.hbm %s2531_s3, 1024 }
  0x28   : > { %p1704_p6 = scmp.ne.s32.totalorder %s2531_s3, %s1703_s23  ;;  %p1710_p0 = scmp.lt.u32.totalorder %s1703_s23, %s2531_s3 }
  0x29   : > { %s2532_s30 = scalar_select %p2128_p10, 1, 0 }
  0x2a   : > { %p1706_p11 = pnand %p2128_p10, %p1704_p6 }
  0x2c   : > { %p1707_p13 = pneg %p1706_p11 }
  0x2e   : > { %p1712_p3 = pnand %p1710_p0, %p1707_p13 }
  0x30   : > { %1715 = shalt.err (!%p1712_p3)
}
  0x31   : > { %s1716_s17 = scalar_lea.vmem %s2100_s24, 1024  ;;  %p1724_p7 = scmp.lt.s32.totalorder %s2100_s24, %s2100_s24 }
  0x32   : > { %p1717_p1 = scmp.ne.s32.totalorder %s2100_s24, %s1716_s17  ;;  %p1725_p12 = scmp.lt.s32.totalorder %s1716_s17, %s1716_s17 }
  0x34   : > { %p1719_p9 = pnand %p1717_p1, %p2128_p10  ;;  %p1726_p6 = por %p1725_p12, %p1724_p7 }
  0x36   : > { %p1720_p8 = pneg %p1719_p9 }
  0x38   : > { %p1727_p11 = pnand %p1726_p6, %p1720_p8 }
  0x3a   : > { %1730 = shalt.err (!%p1727_p11)
}
  0x3b   : > { %s2501_s21 = smov 64   ;;  %s2503_s9 = smov 4  }
  0x3c   : > { %1583 = dma.hbm_to_vmem [thread:$0]  (!%p2108_p2), %s2531_s3, 1024, %s2100_s24, [#allocation11], %s2501_s21, %s2501_s21, %s2503_s9  }
  0x3d   : > { %s2572_s26 = smov (%p2116_p4, %s42_s26), 0  ;;  %p2534_p3 = scmp.lt.s32.totalorder %s1971_s14, 2 }
  0x3e   : > { %2533 = sst [smem:[#allocation25_spill]] %s2572_s26  ;;  %s363_s23 = sand.u32 1, %s1971_s14  }
  0x3f   : > { %p2160_p7 = pnand %p2534_p3, %p2076_p5  ;;  %s46_s17 = ssub.s32 %s1967_s13, %s2572_s26 }
  0x40   : > { %p49_p8 = scmp.eq.s32.totalorder %s46_s17, 0  ;;  %s1324_s12 = sshll.u32 %s2114_s27, 6 }
  0x41   : > { %s2535_s16 = scalar_select %p2160_p7, 1, 0 }
  0x42   : > { %s1376_s4 = sshll.u32 %s1967_s13, 10  ;;  %s2536_s8 = sadd.s32 1, %s1959_s11 }
  0x43   : > { %s2172_s6 = scalar_select %p49_p8, %s1959_s11, %s2536_s8  }
  0x44   : > { %s2538_s1 = sld [smem:[#allocation27_spill]]  ;;  %s367_s18 = scalar_lea.vmem [#allocation7], %s1324_s12 }
  0x45   : > { %2537 = sst [smem:[#allocation26_spill]] %s2172_s6  ;;  %s374_s29 = sshll.u32 %s367_s18, 4  ;;  %s2179_s29 = int_to_ptr.vmem [resolvable:$true] %s374_s29 }
  0x46   : > { %s1976_s21 = smov [#allocation12]   ;;  %s2183_s9 = scalar_lea.sflag [#allocation8], %s363_s23 }
  0x47   : > { %s2181_s17 = sshll.u32 %s1976_s21, 4  ;;  %p2189_p9 = pneg %p2160_p7  ;;  %s312_s17 = int_to_ptr.vmem [resolvable:$true] %s2181_s17 }
  0x49   : > { %s2539_s24 = scalar_select %p2189_p9, 1, 0 }
  0x4a   : > { %s2177_s20 = scalar_lea.hbm %s2538_s1, %s1376_s4  ;;  %s1736_s28 = scalar_lea.hbm %s2538_s1, 2048 }
  0x4b   : > { %s1731_s8 = scalar_lea.hbm %s2177_s20, 1024  ;;  %p1737_p1 = scmp.lt.u32.totalorder %s2177_s20, %s2538_s1 }
  0x4c   : > { %p1732_p5 = scmp.ne.s32.totalorder %s2177_s20, %s1731_s8  ;;  %p1738_p4 = scmp.lt.u32.totalorder %s1736_s28, %s1731_s8 }
  0x4d   : > { %p1740_p6 = scmp.lt.u32.totalorder %s1731_s8, %s2177_s20 }
  0x4e   : > { %p1734_p12 = pnand %p2189_p9, %p1732_p5  ;;  %p1739_p13 = por %p1738_p4, %p1737_p1 }
  0x50   : > { %p1735_p0 = pneg %p1734_p12  ;;  %p1741_p11 = por %p1740_p6, %p1739_p13 }
  0x52   : > { %p1742_p3 = pnand %p1741_p11, %p1735_p0 }
  0x54   : > { %1745 = shalt.err (!%p1742_p3)
}
  0x55   : > { %s1746_s23 = scalar_lea.vmem %s2179_s29, 1024  ;;  %s1977_s4 = smov [#allocation7]  }
  0x56   : > { %p1747_p8 = scmp.ne.s32.totalorder %s2179_s29, %s1746_s23  ;;  %s1751_s12 = sshll.u32 %s1977_s4, 4  ;;  %s1752_s12 = int_to_ptr.vmem [resolvable:$false] %s1751_s12 }
  0x57   : > { %s1753_s18 = scalar_lea.vmem %s1752_s12, 2048  ;;  %p1754_p2 = scmp.lt.s32.totalorder %s2179_s29, %s1752_s12 }
  0x58   : > { %p1749_p5 = pnand %p1747_p8, %p2189_p9  ;;  %p1755_p10 = scmp.lt.s32.totalorder %s1753_s18, %s1746_s23 }
  0x5a   : > { %p1750_p12 = pneg %p1749_p5  ;;  %p1756_p1 = por %p1755_p10, %p1754_p2 }
  0x5c   : > { %p1757_p4 = pnand %p1756_p1, %p1750_p12 }
  0x5e   : > { %1760 = shalt.err (!%p1757_p4)
}
  0x5f   : > { %s2540_s8 = smov 4   ;;  %s2541_s28 = smov 64  }
  0x60   : > { %1596 = dma.hbm_to_vmem [thread:$0]  (!%p2160_p7), %s2177_s20, 1024, %s2179_s29, %s2183_s9, %s2541_s28, %s2541_s28, %s2540_s8  }
  0x61   : > { %s1761_s12 = scalar_lea.hbm %s2487_s5, 1024  ;;  %p2542_p10 = scmp.ne.s32.totalorder %s2532_s30, 0 }
  0x62   : > { %p1762_p2 = scmp.ne.s32.totalorder %s2487_s5, %s1761_s12  ;;  %p1768_p6 = scmp.lt.u32.totalorder %s1761_s12, %s2487_s5 }
  0x64   : > { %p1764_p0 = pnand %p1762_p2, %p2542_p10 }
  0x66   : > { %p1765_p13 = pneg %p1764_p0 }
  0x68   : > { %p1770_p11 = pnand %p1768_p6, %p1765_p13 }
  0x6a   : > { %1773 = shalt.err (!%p1770_p11)
}
  0x6b   : > { %s1774_s26 = scalar_lea.vmem %s312_s17, 1024  ;;  %p1782_p12 = scmp.lt.s32.totalorder %s312_s17, %s312_s17 }
  0x6c   : > { %p1775_p3 = scmp.ne.s32.totalorder %s312_s17, %s1774_s26  ;;  %p1783_p1 = scmp.lt.s32.totalorder %s1774_s26, %s1774_s26 }
  0x6e   : > { %p1777_p8 = pnand %p1775_p3, %p2542_p10  ;;  %p1784_p4 = por %p1783_p1, %p1782_p12 }
  0x70   : > { %p1778_p5 = pneg %p1777_p8 }
  0x72   : > { %p1785_p7 = pnand %p1784_p4, %p1778_p5 }
  0x74   : > { %1788 = shalt.err (!%p1785_p7)
}
  0x75   : > { %p2543_p2 = scmp.ne.s32.totalorder %s2529_s25, 0  ;;  %s1978_s20 = smov [#allocation13]  }
  0x76   : > { %s327_s29 = sshll.u32 %s1978_s20, 4  ;;  %s1322_s21 = sshll.u32 %s2114_s27, 2  ;;  %s328_s29 = int_to_ptr.vmem [resolvable:$true] %s327_s29 }
  0x77   : > { %1586 = dma.hbm_to_vmem [thread:$0]  (!%p2543_p2), %s2487_s5, 1024, %s312_s17, [#allocation11], %s2541_s28, %s2541_s28, %s2540_s8  }
  0x78   : > { %s1789_s12 = scalar_lea.hbm %s2489_s7, 1024 }
  0x79   : > { %p1790_p7 = scmp.ne.s32.totalorder %s2489_s7, %s1789_s12  ;;  %p1796_p6 = scmp.lt.u32.totalorder %s1789_s12, %s2489_s7 }
  0x7b   : > { %p1792_p0 = pnand %p1790_p7, %p2542_p10 }
  0x7d   : > { %p1793_p13 = pneg %p1792_p0 }
  0x7f   : > { %p1798_p11 = pnand %p1796_p6, %p1793_p13 }
  0x81   : > { %1801 = shalt.err (!%p1798_p11)
}
  0x82   : > { %s1802_s17 = scalar_lea.vmem %s328_s29, 1024  ;;  %p1810_p12 = scmp.lt.s32.totalorder %s328_s29, %s328_s29 }
  0x83   : > { %p1803_p3 = scmp.ne.s32.totalorder %s328_s29, %s1802_s17  ;;  %p1811_p1 = scmp.lt.s32.totalorder %s1802_s17, %s1802_s17 }
  0x85   : > { %p1805_p8 = pnand %p1803_p3, %p2542_p10  ;;  %p1812_p4 = por %p1811_p1, %p1810_p12 }
  0x87   : > { %p1806_p5 = pneg %p1805_p8 }
  0x89   : > { %p1813_p9 = pnand %p1812_p4, %p1806_p5 }
  0x8b   : > { %1816 = shalt.err (!%p1813_p9)
}
  0x8c   : > { %1589 = dma.hbm_to_vmem [thread:$0]  (!%p2543_p2), %s2489_s7, 1024, %s328_s29, [#allocation14], %s2541_s28, %s2541_s28, %s2540_s8  }
  0x8d   : > { %s1323_s30 = sshll.u32 %s1967_s13, 6  ;;  %s348_s25 = scalar_lea.vmem [#allocation4], %s1322_s21 }
  0x8e   : > { %s2266_s26 = scalar_lea.hbm %s2482_s0, %s1323_s30  ;;  %s356_s12 = sshll.u32 %s348_s25, 4  ;;  %s357_s12 = int_to_ptr.vmem [resolvable:$true] %s356_s12 }
  0x8f   : > { %s345_s23 = scalar_lea.sflag [#allocation5], %s2114_s27  ;;  %s1817_s18 = scalar_lea.hbm %s2266_s26, 64 }
  0x90   : > { %p1818_p9 = scmp.ne.s32.totalorder %s2266_s26, %s1817_s18  ;;  %p2544_p10 = scmp.ne.s32.totalorder %s2539_s24, 0 }
  0x91   : > { %s1822_s29 = scalar_lea.hbm %s2482_s0, 128  ;;  %p1823_p0 = scmp.lt.u32.totalorder %s2266_s26, %s2482_s0 }
  0x92   : > { %p1820_p2 = pnand %p1818_p9, %p2544_p10  ;;  %p1824_p13 = scmp.lt.u32.totalorder %s1822_s29, %s1817_s18 }
  0x93   : > { %p1826_p11 = scmp.lt.u32.totalorder %s1817_s18, %s2266_s26 }
  0x94   : > { %p1821_p7 = pneg %p1820_p2  ;;  %p1825_p6 = por %p1824_p13, %p1823_p0 }
  0x96   : > { %p1827_p3 = por %p1826_p11, %p1825_p6 }
  0x98   : > { %p1828_p8 = pnand %p1827_p3, %p1821_p7 }
  0x9a   : > { %1831 = shalt.err (!%p1828_p8)
}
  0x9b   : > { %s1832_s6 = scalar_lea.vmem %s357_s12, 64  ;;  %s1979_s3 = smov [#allocation4]  }
  0x9c   : > { %p1833_p5 = scmp.ne.s32.totalorder %s357_s12, %s1832_s6  ;;  %s1837_s20 = sshll.u32 %s1979_s3, 4  ;;  %s1838_s20 = int_to_ptr.vmem [resolvable:$false] %s1837_s20 }
  0x9d   : > { %s1839_s4 = scalar_lea.vmem %s1838_s20, 128  ;;  %p1840_p4 = scmp.lt.s32.totalorder %s357_s12, %s1838_s20 }
  0x9e   : > { %p1835_p12 = pnand %p1833_p5, %p2544_p10  ;;  %p1841_p9 = scmp.lt.s32.totalorder %s1839_s4, %s1832_s6 }
  0xa0   : > { %p1836_p1 = pneg %p1835_p12  ;;  %p1842_p2 = por %p1841_p9, %p1840_p4 }
  0xa2   : > { %p1843_p0 = pnand %p1842_p2, %p1836_p1 }
  0xa4   : > { %1846 = shalt.err (!%p1843_p0)
}
  0xa5   : > { %p2545_p13 = scmp.ne.s32.totalorder %s2535_s16, 0  ;;  %s2293_s8 = scalar_lea.hbm %s2484_s2, %s1323_s30 }
  0xa6   : > { %s388_s28 = scalar_lea.vmem [#allocation9], %s1322_s21  ;;  %s1847_s1 = scalar_lea.hbm %s2293_s8, 64 }
  0xa7   : > { %1593 = dma.hbm_to_vmem [thread:$0]  (!%p2545_p13), %s2266_s26, 64, %s357_s12, %s345_s23  }
  0xa8   : > { %s396_s29 = sshll.u32 %s388_s28, 4  ;;  %p1848_p7 = scmp.ne.s32.totalorder %s2293_s8, %s1847_s1  ;;  %s397_s29 = int_to_ptr.vmem [resolvable:$true] %s396_s29 }
  0xa9   : > { %s1852_s23 = scalar_lea.hbm %s2484_s2, 128  ;;  %p1853_p3 = scmp.lt.u32.totalorder %s2293_s8, %s2484_s2 }
  0xaa   : > { %p1850_p6 = pnand %p1848_p7, %p2544_p10  ;;  %p1854_p8 = scmp.lt.u32.totalorder %s1852_s23, %s1847_s1 }
  0xab   : > { %p1856_p12 = scmp.lt.u32.totalorder %s1847_s1, %s2293_s8 }
  0xac   : > { %p1851_p11 = pneg %p1850_p6  ;;  %p1855_p5 = por %p1854_p8, %p1853_p3 }
  0xae   : > { %p1857_p1 = por %p1856_p12, %p1855_p5 }
  0xb0   : > { %p1858_p4 = pnand %p1857_p1, %p1851_p11 }
  0xb2   : > { %1861 = shalt.err (!%p1858_p4)
}
  0xb3   : > { %s1862_s27 = scalar_lea.vmem %s397_s29, 64  ;;  %s1980_s21 = smov [#allocation9]  }
  0xb4   : > { %p1863_p9 = scmp.ne.s32.totalorder %s397_s29, %s1862_s27  ;;  %s1867_s6 = sshll.u32 %s1980_s21, 4  ;;  %s1868_s6 = int_to_ptr.vmem [resolvable:$false] %s1867_s6 }
  0xb5   : > { %s1869_s3 = scalar_lea.vmem %s1868_s6, 128  ;;  %p1870_p7 = scmp.lt.s32.totalorder %s397_s29, %s1868_s6 }
  0xb6   : > { %p1865_p2 = pnand %p1863_p9, %p2544_p10  ;;  %p1871_p6 = scmp.lt.s32.totalorder %s1869_s3, %s1862_s27 }
  0xb8   : > { %p1866_p0 = pneg %p1865_p2  ;;  %p1872_p13 = por %p1871_p6, %p1870_p7 }
  0xba   : > { %p1873_p3 = pnand %p1872_p13, %p1866_p0 }
  0xbc   : > { %1876 = shalt.err (!%p1873_p3)
}
  0xbd   : > { %p2546_p8 = scmp.ne.s32.totalorder %s2535_s16, 0  ;;  %p2547_p11 = scmp.ne.s32.totalorder %s2528_s22, 0 }
  0xbe   : > { %s2318_s24 = sand.u32 (!%p2547_p11), 1, %s1955_s10   ;;  %p2548_p10 = scmp.ne.s32.totalorder (!%p2547_p11), %s2523_s19, 0 }
  0xbf   : > { %1599 = dma.hbm_to_vmem [thread:$0]  (!%p2546_p8), %s2293_s8, 64, %s397_s29, %s2183_s9  }
  0xc0   : > { %405 = sbr.rel (%p2547_p11) target bundleno = 1128 (0x468), region = 56  ;;  %s1330_s20 = sshll.u32 (!%p2547_p11), %s2318_s24, 2 }
  0xc1   : > { %s408_s4 = scalar_lea.sflag (!%p2547_p11), [#allocation5], %s2318_s24  ;;  %s2322_s25 = scalar_lea.vmem (!%p2547_p11), [#allocation4], %s1330_s20 }
  0xc7   : > { %1930 = dma.done.wait (%p2548_p10), %s408_s4, 64  }
  0xc8   : > { %1932 = vsyncadd (%p2548_p10), %s408_s4, 4294967232  ;;  %s416_s22 = sand.u32 1, %s2065_s15   ;;  %s1331_s9 = sshll.u32 %s2318_s24, 6 }
  0xc9   : > { %s417_s16 = scalar_lea.sflag [#allocation8], %s416_s22  ;;  %s2330_s18 = scalar_lea.vmem [#allocation7], %s1331_s9 }
  0xca   : > { %1934 = dma.done.wait (%p2548_p10), %s417_s16, 1088  }
  0xcb   : > { %1936 = vsyncadd (%p2548_p10), %s417_s16, 4294966208  ;;  %s2336_s8 = scalar_lea.vmem [#allocation9], %s1330_s20  ;;  %p2549_p13 = scmp.eq.s32.totalorder %s2065_s15, 0 }
  0xcd   : > { %1938 = dma.done.wait (%p2549_p13), [#allocation11], 2048   ;;  %p2550_p5 = pmov %p2549_p13 }
  0xcf   : > { %1940 = vsyncadd (%p2550_p5), [#allocation11], 4294965248  ;;  %p2551_p12 = pmov %p2550_p5 }
  0xd0   : > { %p2552_p1 = pmov %p2550_p5 }
  0xd1   : > { %1942 = dma.done.wait (%p2551_p12), [#allocation14], 1024  }
  0xd2   : > { %1944 = vsyncadd (%p2552_p1), [#allocation14], 4294966272  ;;  %v1667_v0 = vld [vmem:[#allocation12] sm:$0xff]   ;;  %v1668_v1 = vld [vmem:[#allocation12 + $0x8] sm:$0xff]   ;;  %v1981_v15 = vmov 0.0   ;;  %vm1982_vm0 = vmmov 0  }
  0xd3   : > { %1436 = vmatprep.subr.bf16.mxu0 %v1667_v0  ;;  %v1669_v2 = vld [vmem:[#allocation12 + $0x10] sm:$0xff]   ;;  %v1670_v3 = vld [vmem:[#allocation12 + $0x18] sm:$0xff]   ;;  %v1671_v5 = vld [vmem:[#allocation12 + $0x20] sm:$0xff]   ;;  %s2553_s28 = sld [smem:[#allocation30_spill]]  ;;  %s2554_s26 = sld [smem:[#allocation31_spill]] }
  0xd4   : > { %1437 = vmatpush3.bf16.msra.mxu0 %v1667_v0  ;;  %v1675_v4 = vld [vmem:[%s2330_s18] sm:$0xff]   ;;  %v1672_v6 = vld [vmem:[#allocation12 + $0x28] sm:$0xff]   ;;  %v1673_v7 = vld [vmem:[#allocation12 + $0x30] sm:$0xff]   ;;  %s2555_s17 = sld [smem:[#allocation29_spill]]  ;;  %s2556_s30 = sld [smem:[#allocation22_spill]] }
  0xd5   : > { %1438 = vmatprep.subr.bf16.mxu0 %v1668_v1  ;;  %1452 = vmatprep.mubr.bf16.mxu0 %v1675_v4  ;;  %v1674_v8 = vld [vmem:[#allocation12 + $0x38] sm:$0xff]   ;;  %v1691_v9 = vld [vmem:[#allocation13] sm:$0xff]   ;;  %v1692_v10 = vld [vmem:[#allocation13 + $0x8] sm:$0xff]   ;;  %s1336_s27 = sshll.u32 %s2318_s24, 3  ;;  %s2557_s21 = sld [smem:[#allocation23_spill]] }
  0xd6   : > { %1484 = vmatprep.mubr.bf16.mxu1 %v1675_v4  ;;  %1468 = vmatprep.subr.bf16.mxu1 %v1691_v9  ;;  %v1676_v11 = vld [vmem:[%s2330_s18 + $0x8] sm:$0xff]   ;;  %v1693_v12 = vld [vmem:[#allocation13 + $0x10] sm:$0xff]   ;;  %v1677_v13 = vld [vmem:[%s2330_s18 + $0x10] sm:$0xff]   ;;  %s485_s3 = scalar_lea.vmem [#allocation15], %s1336_s27  ;;  %s2558_s22 = sld [smem:[#allocation32_spill]] }
  0xd7   : > { %1469 = vmatpush3.bf16.msra.mxu1 %v1691_v9  ;;  %v1681_v14 = vld [vmem:[#allocation10] sm:$0xff]   ;;  %v1694_v16 = vld [vmem:[#allocation13 + $0x18] sm:$0xff]   ;;  %v1682_v17 = vld [vmem:[#allocation10 + $0x8] sm:$0xff]   ;;  %s1162_s20 = sshll.u32 %s485_s3, 4  ;;  %s1148_s16 = scalar_lea.sflag [#allocation6], %s2318_s24  ;;  %s2435_s20 = int_to_ptr.vmem [resolvable:$true] %s1162_s20 }
  0xd8   : > { %1439 = vmatpush3.bf16.msra.mxu0 %v1668_v1  ;;  %1470 = vmatprep.subr.bf16.mxu1 %v1692_v10  ;;  %v1695_v18 = vld [vmem:[#allocation13 + $0x20] sm:$0xff]   ;;  %v1678_v19 = vld [vmem:[%s2330_s18 + $0x18] sm:$0xff]   ;;  %v1679_v20 = vld [vmem:[%s2330_s18 + $0x20] sm:$0xff]  }
  0xd9   : > { %1440 = vmatprep.subr.bf16.mxu0 %v1669_v2  ;;  %v1683_v21 = vld [vmem:[#allocation10 + $0x10] sm:$0xff]   ;;  %v1696_v22 = vld [vmem:[#allocation13 + $0x28] sm:$0xff]   ;;  %v1685_v23 = vld [vmem:[#allocation10 + $0x18] sm:$0xff]  }
  0xda   : > { %v1697_v24 = vld [vmem:[#allocation13 + $0x30] sm:$0xff]   ;;  %v1680_v25 = vld [vmem:[%s2330_s18 + $0x28] sm:$0xff]   ;;  %v1684_v26 = vld [vmem:[%s2330_s18 + $0x30] sm:$0xff]   ;;  %s1373_s6 = sshll.u32 %s2556_s30, 7 }
  0xdb   : > { %1471 = vmatpush3.bf16.msra.mxu1 %v1692_v10  ;;  %v1687_v27 = vld [vmem:[#allocation10 + $0x20] sm:$0xff]   ;;  %v1698_v28 = vld [vmem:[#allocation13 + $0x38] sm:$0xff]   ;;  %v1688_v29 = vld [vmem:[#allocation10 + $0x28] sm:$0xff]   ;;  %p2559_p9 = scmp.ne.s32.totalorder %s2557_s21, 0 }
  0xdc   : > { %1441 = vmatpush3.bf16.msra.mxu0 %v1669_v2  ;;  %1472 = vmatprep.subr.bf16.mxu1 %v1693_v12  ;;  %v1686_v30 = vld [vmem:[%s2330_s18 + $0x38] sm:$0xff]   ;;  %v1690_v32 = vld [vmem:[#allocation10 + $0x38] sm:$0xff]   ;;  %s2433_s9 = scalar_lea.hbm %s2558_s22, %s1373_s6  ;;  %s1877_s18 = scalar_lea.vmem %s2435_s20, 128 }
  0xdd   : > { %1442 = vmatprep.subr.bf16.mxu0 %v1670_v3  ;;  %v1689_v31 = vld [vmem:[#allocation10 + $0x30] sm:$0xff]   ;;  %p1878_p4 = scmp.ne.s32.totalorder %s2435_s20, %s1877_s18 }
  0xde   : > { %v923_v33 = vld [vmem:[%s2322_s25] sm:$0xf] }
  0xdf   : > { %1473 = vmatpush3.bf16.msra.mxu1 %v1693_v12  ;;  %v1337_v35 = vld [vmem:[%s2553_s28] ss:$0 sm:$0xff]  ;;  %p1879_p2 = pnand %p1878_p4, %p2559_p9 }
  0xe0   : > { %1443 = vmatpush3.bf16.msra.mxu0 %v1670_v3  ;;  %1474 = vmatprep.subr.bf16.mxu1 %v1694_v16  ;;  %v2385_v4 = vld [vmem:[%s2554_s26] ss:$0 sm:$0xff] }
  0xe1   : > { %1444 = vmatprep.subr.bf16.mxu0 %v1671_v5  ;;  %p1880_p0 = pneg %p1879_p2 }
  0xe3   : > { %1475 = vmatpush3.bf16.msra.mxu1 %v1694_v16 }
  0xe4   : > { %1445 = vmatpush3.bf16.msra.mxu0 %v1671_v5  ;;  %1476 = vmatprep.subr.bf16.mxu1 %v1695_v18 }
  0xe5   : > { %1446 = vmatprep.subr.bf16.mxu0 %v1672_v6 }
  0xe7   : > { %1477 = vmatpush3.bf16.msra.mxu1 %v1695_v18 }
  0xe8   : > { %1447 = vmatpush3.bf16.msra.mxu0 %v1672_v6  ;;  %1478 = vmatprep.subr.bf16.mxu1 %v1696_v22 }
  0xe9   : > { %1448 = vmatprep.subr.bf16.mxu0 %v1673_v7 }
  0xeb   : > { %1479 = vmatpush3.bf16.msra.mxu1 %v1696_v22 }
  0xec   : > { %1449 = vmatpush3.bf16.msra.mxu0 %v1673_v7  ;;  %1480 = vmatprep.subr.bf16.mxu1 %v1697_v24 }
  0xed   : > { %1450 = vmatprep.subr.bf16.mxu0 %v1674_v8 }
  0xef   : > { %1481 = vmatpush3.bf16.msra.mxu1 %v1697_v24 }
  0xf0   : > { %1451 = vmatpush3.bf16.msra.mxu0 %v1674_v8  ;;  %1482 = vmatprep.subr.bf16.mxu1 %v1698_v28 }
  0xf1   : > { %1500 = vmatprep.subr.bf16.mxu0 %v1981_v15 }
  0xf3   : > { %1453 = vmatmul.mubr.bf16.vlgmr.msra.gmra.mrb[0].mxu0 %v1676_v11  ;;  %1483 = vmatpush3.bf16.msra.mxu1 %v1698_v28 }
  0xf4   : > { %1456 = vmatprep.mubr.bf16.mxu0 %v1677_v13  ;;  %1501 = vmatpush3.bf16.msra.mxu0 %v1681_v14 }
  0xf5   : > { %1502 = vmatprep.subr.bf16.mxu0 %v1981_v15  ;;  %1520 = vmatprep.subr.bf16.mxu1 %v1981_v15 }
  0xf6   : > { %1485 = vmatmul.mubr.bf16.vlgmr.msra.gmra.mrb[0].mxu1 %v1676_v11 }
  0xf7   : > { %1488 = vmatprep.mubr.bf16.mxu1 %v1677_v13 }
  0xf8   : > { %1503 = vmatpush3.bf16.msra.mxu0 %v1682_v17 }
  0xf9   : > { %1504 = vmatprep.subr.bf16.mxu0 %v1981_v15 }
  0xfb   : > { %1457 = vmatmul.mubr.bf16.gmra.mrb[4].mxu0 %v1678_v19 }
  0xfc   : > { %1460 = vmatprep.mubr.bf16.mxu0 %v1679_v20  ;;  %1505 = vmatpush3.bf16.msra.mxu0 %v1683_v21 }
  0xfd   : > { %1506 = vmatprep.subr.bf16.mxu0 %v1981_v15 }
  0xfe   : > { %1489 = vmatmul.mubr.bf16.gmra.mrb[4].mxu1 %v1678_v19 }
  0xff   : > { %1492 = vmatprep.mubr.bf16.mxu1 %v1679_v20 }
 0x100   : > { %1507 = vmatpush3.bf16.msra.mxu0 %v1685_v23 }
 0x101   : > { %1508 = vmatprep.subr.bf16.mxu0 %v1981_v15 }
 0x103   : > { %1461 = vmatmul.mubr.bf16.gmra.mrb[8].mxu0 %v1680_v25 }
 0x104   : > { %1464 = vmatprep.mubr.bf16.mxu0 %v1684_v26  ;;  %1509 = vmatpush3.bf16.msra.mxu0 %v1687_v27 }
 0x105   : > { %1510 = vmatprep.subr.bf16.mxu0 %v1981_v15 }
 0x106   : > { %1493 = vmatmul.mubr.bf16.gmra.mrb[8].mxu1 %v1680_v25 }
 0x107   : > { %1496 = vmatprep.mubr.bf16.mxu1 %v1684_v26 }
 0x108   : > { %1511 = vmatpush3.bf16.msra.mxu0 %v1688_v29 }
 0x109   : > { %1512 = vmatprep.subr.bf16.mxu0 %v1981_v15 }
 0x10b   : > { %1465 = vmatmul.mubr.bf16.gmra.mrb[12].mxu0 %v1686_v30 }
 0x10c   : > { %1513 = vmatpush3.bf16.msra.mxu0 %v1689_v31  ;;  %1516 = vmatprep.mubr.msk.bf16.mxu0 %vm1982_vm0, %v1981_v15 }
 0x10d   : > { %1514 = vmatprep.subr.bf16.mxu0 %v1981_v15 }
 0x10e   : > { %1497 = vmatmul.mubr.bf16.gmra.mrb[12].mxu1 %v1686_v30 }
 0x10f   : > { %1536 = vmatprep.mubr.msk.bf16.mxu1 %vm1982_vm0, %v1981_v15 }
 0x110   : > { %1515 = vmatpush3.bf16.msra.mxu0 %v1690_v32 }
 0x111   : > { %1540 = vmatprep.subr.bf16.mxu0 %v1981_v15 }
 0x113   : > { %1517 = vmatmul.mubr.bf16.vlgmr.msra.gmra.mrb[16].mxu0 %v923_v33 }
 0x114   : > { %1556 = vmatprep.mubr.msk.bf16.mxu0 %vm1982_vm0, %v1981_v15 }
 0x1c6   : > { %v1454_v34 = vpop.f32.mrb[0].mxu0 }
 0x1c7   : > { %v660_v36 = vpop.f32.mrb[1].mxu0  ;;  %v669_v38 = vadd.f32 %v1454_v34, %v1337_v35 }
 0x1c8   : > { %v1455_v37 = vpop.f32.mrb[2].mxu0  ;;  %v661_v41 = vadd.f32 %v1337_v35, %v660_v36 }
 0x1c9   : > { %v672_v39 = vadd.f32 %v1455_v37, %v1337_v35  ;;  %v663_v40 = vpop.f32.mrb[3].mxu0  ;;  %v1486_v7 = vpop.f32.mrb[0].mxu1 }
 0x1ca   : > { %v664_v42 = vadd.f32 %v1337_v35, %v663_v40  ;;  %v837_v10 = vadd.f32 %v1486_v7, %v2385_v4  ;;  %v828_v11 = vpop.f32.mrb[1].mxu1 }
 0x1cb   : > { %v892_v43 = vpack.c.bf16 %v672_v39, %v669_v38  ;;  %v829_v13 = vadd.f32 %v2385_v4, %v828_v11  ;;  %v1487_v14 = vpop.f32.mrb[2].mxu1 }
 0x1cc   : > { %v891_v44 = vpack.c.bf16 %v664_v42, %v661_v41  ;;  %v840_v17 = vadd.f32 %v1487_v14, %v2385_v4  ;;  %v831_v18 = vpop.f32.mrb[3].mxu1 }
 0x1cd   : > { %v832_v20 = vadd.f32 %v2385_v4, %v831_v18 }
 0x1ce   : > { %1521 = vmatpush3.bf16.xpose.msra.mxu1 %v891_v44  ;;  %v1458_v45 = vpop.f32.mrb[4].mxu0  ;;  %v908_v21 = vpack.c.bf16 %v840_v17, %v837_v10 }
 0x1cf   : > { %v685_v46 = vadd.f32 %v1458_v45, %v1337_v35  ;;  %v676_v47 = vpop.f32.mrb[5].mxu0  ;;  %1522 = vmatprep.subr.bf16.mxu1 %v1981_v15  ;;  %v907_v23 = vpack.c.bf16 %v832_v20, %v829_v13 }
 0x1d0   : > { %v677_v48 = vadd.f32 %v1337_v35, %v676_v47  ;;  %v1459_v49 = vpop.f32.mrb[6].mxu0 }
 0x1d1   : > { %v688_v50 = vadd.f32 %v1459_v49, %v1337_v35  ;;  %v679_v51 = vpop.f32.mrb[7].mxu0  ;;  %1541 = vmatpush3.bf16.msra.mxu0 %v907_v23  ;;  %v1490_v26 = vpop.f32.mrb[4].mxu1 }
 0x1d2   : > { %v680_v52 = vadd.f32 %v1337_v35, %v679_v51  ;;  %1542 = vmatprep.subr.bf16.mxu0 %v1981_v15  ;;  %v853_v28 = vadd.f32 %v1490_v26, %v2385_v4  ;;  %v844_v29 = vpop.f32.mrb[5].mxu1 }
 0x1d3   : > { %v894_v53 = vpack.c.bf16 %v688_v50, %v685_v46  ;;  %v845_v30 = vadd.f32 %v2385_v4, %v844_v29  ;;  %v1491_v31 = vpop.f32.mrb[6].mxu1 }
 0x1d4   : > { %v893_v54 = vpack.c.bf16 %v680_v52, %v677_v48  ;;  %v856_v32 = vadd.f32 %v1491_v31, %v2385_v4  ;;  %v847_v33 = vpop.f32.mrb[7].mxu1 }
 0x1d5   : > { %1543 = vmatpush3.bf16.msra.mxu0 %v908_v21  ;;  %v848_v34 = vadd.f32 %v2385_v4, %v847_v33 }
 0x1d6   : > { %1523 = vmatpush3.bf16.xpose.msra.mxu1 %v892_v43  ;;  %v1462_v55 = vpop.f32.mrb[8].mxu0  ;;  %1544 = vmatprep.subr.bf16.mxu0 %v1981_v15 }
 0x1d7   : > { %1524 = vmatprep.subr.bf16.mxu1 %v1981_v15  ;;  %v2373_v56 = vadd.f32 %v1462_v55, %v1337_v35  ;;  %v692_v57 = vpop.f32.mrb[9].mxu0  ;;  %v909_v36 = vpack.c.bf16 %v848_v34, %v845_v30 }
 0x1d8   : > { %v693_v58 = vadd.f32 %v1337_v35, %v692_v57  ;;  %v1463_v59 = vpop.f32.mrb[10].mxu0  ;;  %v1363_v57 = vld [vmem:[%s2555_s17] ss:$0 sm:$0xff] }
 0x1d9   : > { %v2375_v60 = vadd.f32 %v1463_v59, %v1337_v35  ;;  %v695_v61 = vpop.f32.mrb[11].mxu0  ;;  %v1494_v37 = vpop.f32.mrb[8].mxu1  ;;  %1545 = vmatpush3.bf16.msra.mxu0 %v909_v36 }
 0x1da   : > { %v696_v62 = vadd.f32 %v1337_v35, %v695_v61  ;;  %v869_v38 = vadd.f32 %v1494_v37, %v2385_v4  ;;  %v860_v39 = vpop.f32.mrb[9].mxu1  ;;  %1546 = vmatprep.subr.bf16.mxu0 %v1981_v15 }
 0x1db   : > { %v896_v63 = vpack.c.bf16 %v2375_v60, %v2373_v56  ;;  %v861_v40 = vadd.f32 %v2385_v4, %v860_v39  ;;  %v1495_v41 = vpop.f32.mrb[10].mxu1  ;;  %v1085_v60 = vld [vmem:[%s2336_s8] sm:$0xf]  ;;  %s1983_s8 = smov [#allocation15]  }
 0x1dc   : > { %v895_v0 = vpack.c.bf16 %v696_v62, %v693_v58  ;;  %v872_v42 = vadd.f32 %v1495_v41, %v2385_v4  ;;  %v863_v43 = vpop.f32.mrb[11].mxu1  ;;  %v1086_v61 = vunpack.c.l.bf16 %v1085_v60  ;;  %s1881_s15 = sshll.u32 %s1983_s8, 4  ;;  %s1882_s15 = int_to_ptr.vmem [resolvable:$false] %s1881_s15 }
 0x1dd   : > { %v864_v44 = vadd.f32 %v2385_v4, %v863_v43  ;;  %s1883_s19 = scalar_lea.vmem %s1882_s15, 256  ;;  %p1884_p7 = scmp.lt.s32.totalorder %s2435_s20, %s1882_s15 }
 0x1de   : > { %1525 = vmatpush3.bf16.xpose.msra.mxu1 %v893_v54  ;;  %v1466_v1 = vpop.f32.mrb[12].mxu0  ;;  %v912_v45 = vpack.c.bf16 %v872_v42, %v869_v38  ;;  %p1885_p6 = scmp.lt.s32.totalorder %s1883_s19, %s1877_s18 }
 0x1df   : > { %1526 = vmatprep.subr.bf16.mxu1 %v1981_v15  ;;  %v2380_v2 = vadd.f32 %v1466_v1, %v1337_v35  ;;  %v708_v3 = vpop.f32.mrb[13].mxu0  ;;  %v911_v46 = vpack.c.bf16 %v864_v44, %v861_v40 }
 0x1e0   : > { %v2387_v5 = vadd.f32 %v1337_v35, %v708_v3  ;;  %v1467_v6 = vpop.f32.mrb[14].mxu0  ;;  %p1886_p3 = por %p1885_p6, %p1884_p7 }
 0x1e1   : > { %v2389_v8 = vadd.f32 %v1467_v6, %v1337_v35  ;;  %v711_v9 = vpop.f32.mrb[15].mxu0  ;;  %v1498_v47 = vpop.f32.mrb[12].mxu1 }
 0x1e2   : > { %v712_v12 = vadd.f32 %v1337_v35, %v711_v9  ;;  %v910_v35 = vpack.c.bf16 %v856_v32, %v853_v28  ;;  %v885_v48 = vadd.f32 %v1498_v47, %v2385_v4  ;;  %v876_v49 = vpop.f32.mrb[13].mxu1  ;;  %p1887_p8 = pnand %p1886_p3, %p1880_p0 }
 0x1e3   : > { %v898_v16 = vpack.c.bf16 %v2389_v8, %v2380_v2  ;;  %v877_v50 = vadd.f32 %v2385_v4, %v876_v49  ;;  %v1499_v51 = vpop.f32.mrb[14].mxu1 }
 0x1e4   : > { %v897_v19 = vpack.c.bf16 %v712_v12, %v2387_v5  ;;  %1547 = vmatpush3.bf16.msra.mxu0 %v910_v35  ;;  %v888_v52 = vadd.f32 %v1499_v51, %v2385_v4 }
 0x1e5   : > { %1548 = vmatprep.subr.bf16.mxu0 %v1981_v15 }
 0x1e6   : > { %1527 = vmatpush3.bf16.xpose.msra.mxu1 %v894_v53  ;;  %v1029_v22 = vpop.f32.mrb[16].mxu0  ;;  %v879_v53 = vpop.f32.mrb[15].mxu1  ;;  %v914_v55 = vpack.c.bf16 %v888_v52, %v885_v48 }
 0x1e7   : > { %1528 = vmatprep.subr.bf16.mxu1 %v1981_v15  ;;  %v1518_v24 = vpop.f32.mrb[17].mxu0  ;;  %v880_v54 = vadd.f32 %v2385_v4, %v879_v53  ;;  %v1030_v58 = vadd.f32 %v1363_v57, %v1029_v22 }
 0x1e8   : > { %v1032_v25 = vpop.f32.mrb[18].mxu0  ;;  %1549 = vmatpush3.bf16.msra.mxu0 %v911_v46 }
 0x1e9   : > { %v1519_v27 = vpop.f32.mrb[19].mxu0  ;;  %1550 = vmatprep.subr.bf16.mxu0 %v1981_v15  ;;  %v913_v56 = vpack.c.bf16 %v880_v54, %v877_v50  ;;  %v1035_v59 = vpack.c.bf16 %v1030_v58, %v1030_v58 }
 0x1ec   : > { %1551 = vmatpush3.bf16.msra.mxu0 %v912_v45 }
 0x1ed   : > { %1552 = vmatprep.subr.bf16.mxu0 %v1981_v15 }
 0x1ee   : > { %1529 = vmatpush3.bf16.xpose.msra.mxu1 %v895_v0 }
 0x1ef   : > { %1530 = vmatprep.subr.bf16.mxu1 %v1981_v15 }
 0x1f0   : > { %1553 = vmatpush3.bf16.msra.mxu0 %v913_v56 }
 0x1f1   : > { %1554 = vmatprep.subr.bf16.mxu0 %v1981_v15 }
 0x1f4   : > { %1555 = vmatpush3.bf16.msra.mxu0 %v914_v55 }
 0x1f6   : > { %1531 = vmatpush3.bf16.xpose.msra.mxu1 %v896_v63 }
 0x1f7   : > { %1532 = vmatprep.subr.bf16.mxu1 %v1981_v15 }
 0x1fe   : > { %1533 = vmatpush3.bf16.xpose.msra.mxu1 %v897_v19 }
 0x1ff   : > { %1534 = vmatprep.subr.bf16.mxu1 %v1981_v15 }
 0x206   : > { %1535 = vmatpush3.bf16.xpose.msra.mxu1 %v898_v16 }
 0x20d   : > { %1537 = vmatmul.mubr.bf16.vlgmr.msra.gmra.mrb[16].mxu1 %v1035_v59 }
 0x2e0   : > { %v1078_v62 = vpop.f32.mrb[16].mxu1 }
 0x2e1   : > { %v1084_v63 = vmul.f32 0.17677669, %v1078_v62  ;;  %v1538_v0 = vpop.f32.mrb[17].mxu1 }
 0x2e2   : > { %v1081_v15 = vpop.f32.mrb[18].mxu1 }
 0x2e3   : > { %v1539_v1 = vpop.f32.mrb[19].mxu1  ;;  %v1087_v3 = vadd.f32 %v1086_v61, %v1084_v63 }
 0x2e5   : > { %1088 = vmax.xlane.f32.xlu0 %v1087_v3 }
 0x372   : > { %v1089_v4 = vpop.xlane.xlu0 %1088 }
 0x373   : > { %v1090_v5 = vsub.f32 %v1087_v3, %v1089_v4 }
 0x375   : > { %v1091_v6 = vmul.f32 1.442695, %v1090_v5 }
 0x377   : > { %1699 = vpow2.f32 %v1091_v6 }
 0x381   : > { %v1700_v7 = vpop.eup %1699 }
 0x382   : > { %1093 = vadd.xlane.f32.xlu0 %v1700_v7  ;;  %v1095_v2 = vpack.c.bf16 %v1700_v7, %v1700_v7 }
 0x384   : > { %1557 = vmatmul.mubr.bf16.vlgmr.msra.gmra.mrb[20].mxu0 %v1095_v2 }
 0x40f   : > { %v1094_v8 = vpop.xlane.xlu0 %1093 }
 0x410   : > { %1701 = vrcp.f32 %v1094_v8 }
 0x41a   : > { %v1702_v9 = vpop.eup %1701 }
 0x457   : > { %v1138_v10 = vpop.f32.mrb[20].mxu0 }
 0x458   : > { %v1145_v11 = vmul.f32 %v1702_v9, %v1138_v10  ;;  %v1558_v12 = vpop.f32.mrb[21].mxu0 }
 0x459   : > { %v1141_v13 = vpop.f32.mrb[22].mxu0 }
 0x45a   : > { %1146 = vst [vmem:[%s485_s3] sm:$0xff] %v1145_v11  ;;  %v1559_v14 = vpop.f32.mrb[23].mxu0 }
 0x45b   : > { %1890 = shalt.err (!%p1887_p8)
}
 0x45c   : > { %s1891_s24 = scalar_lea.hbm %s2433_s9, 128  ;;  %s1895_s1 = scalar_lea.hbm %s2558_s22, 256 }
 0x45d   : > { %p1892_p11 = scmp.ne.s32.totalorder %s2433_s9, %s1891_s24  ;;  %p1896_p5 = scmp.lt.u32.totalorder %s2433_s9, %s2558_s22 }
 0x45e   : > { %p1897_p12 = scmp.lt.u32.totalorder %s1895_s1, %s1891_s24  ;;  %p1899_p4 = scmp.lt.u32.totalorder %s1891_s24, %s2433_s9 }
 0x45f   : > { %p1893_p10 = pnand %p1892_p11, %p2559_p9 }
 0x460   : > { %p1898_p1 = por %p1897_p12, %p1896_p5 }
 0x461   : > { %p1894_p13 = pneg %p1893_p10 }
 0x462   : > { %p1900_p2 = por %p1899_p4, %p1898_p1 }
 0x464   : > { %p1901_p0 = pnand %p1900_p2, %p1894_p13 }
 0x466   : > { %1904 = shalt.err (!%p1901_p0)
}
 0x467   : > { %1578 = dma.vmem_to_hbm [thread:$0]  (%p2559_p9), %s2435_s20, 128, %s2433_s9, %s1148_s16  }
 0x468 PF: > { %s2560_s23 = sld [smem:[#allocation21_spill]]  ;;  %s2561_s17 = sld [smem:[#allocation24_spill]] }
 0x469   : > { %p2563_p6 = scmp.ge.s32.totalorder %s1971_s14, 2 }
 0x46e   : > { %s1174_s30 = sand.u32 1, %s2560_s23   ;;  %p2562_p7 = scmp.ne.s32.totalorder %s2561_s17, 0 }
 0x46f   : > { %s1175_s27 = scalar_lea.sflag [#allocation6], %s1174_s30 }
 0x470   : > { %p1601_p3 = pnand %p2563_p6, %p2562_p7 }
 0x472   : > { %1946 = dma.done.wait (!%p1601_p3), %s1175_s27, 128  }
 0x473   : > { %1948 = vsyncadd (!%p1601_p3), %s1175_s27, 4294967168  ;;  %s30_s14 = sadd.s32 1, %s1971_s14   ;;  %s2564_s21 = sld [smem:[#allocation26_spill]] }
 0x474   : > { %p27_p8 = scmp.ge.s32.totalorder %s30_s14, 4   ;;  %s2565_s6 = sld [smem:[#allocation25_spill]] }
 0x475   : > { %s2566_s30 = smov %s1955_s10  ;;  %s2567_s10 = smov %s1959_s11 }
 0x476   : > { %s2569_s12 = smov %s1967_s13  ;;  %29 = sbr.rel (!%p27_p8) target bundleno = 17 (0x11), region = 141 }
 0x479   : > { %s2568_s11 = smov %s2564_s21 }
 0x47a   : > { %s2570_s13 = smov %s2565_s6 }
 0x47d   :  { %1180 = vsyncpa [#allocation5], 1 }
 0x47e   :  { %1182 = vsyncpa [#allocation5 + $0x1], 1 }
 0x47f   :  { %1183 = vsyncpa [#allocation8], 1 }
 0x480   :  { %1185 = vsyncpa [#allocation8 + $0x1], 1 }
 0x481   :  { %1186 = vsyncpa [#allocation11], 1 }
 0x482   :  { %1187 = vsyncpa [#allocation14], 1 }
 0x483   :  { %1188 = vsyncpa [#allocation6], 1 }
 0x484   :  { %1190 = vsyncpa [#allocation6 + $0x1], 1 }

</bundles_post_ra>
